<compile_context>
chip_gen: v7x
topology: tpu7x:2x2x1
jax: 0.10.0
libtpu: 0.0.40
codegen_flags: <defaults>
</compile_context>

<pallas_src>
import jax
import jax.numpy as jnp
from jax.experimental import pallas as pl
from jax.experimental.pallas import tpu as pltpu


def _round_up(x: int, m: int) -> int:
    return ((x + m - 1) // m) * m


def _device_kind() -> str:
    try:
        return jax.devices()[0].device_kind.lower()
    except Exception:
        return ""


def _epilogue_dtype():
    # bf16 VPU/EUP exist on v6e/v7x -> bf16 bias+tanh epilogue there.
    # v5e (and older) lack bf16 vector/transcendental units -> keep f32.
    kind = _device_kind()
    if ("v6" in kind) or ("v7" in kind):
        return jnp.bfloat16
    return jnp.float32


def _min_grid() -> int:
    # v7x: 2 TensorCores share the grid -> keep >= 4 tiles (2 per core) when the
    # batch allows, so both cores get work and each still double-buffers.
    return 4 if "v7" in _device_kind() else 1


def _make_policy_kernel(epilogue_dtype):
    def kernel(x_ref, w1_ref, b1_ref, w2_ref, b2_ref, o_ref):
        # In-kernel bf16 cast of the raw f32 observations (no wrapper pad/convert).
        x = x_ref[...].astype(jnp.bfloat16)                          # [TB, OBS]
        h = jnp.dot(x, w1_ref[...], preferred_element_type=jnp.float32)
        # Bias + tanh epilogue in the generation-appropriate dtype.
        h = jnp.tanh(h.astype(epilogue_dtype) + b1_ref[...])         # [TB, HID_P]
        out = jnp.dot(h.astype(jnp.bfloat16), w2_ref[...],
                      preferred_element_type=jnp.float32)            # [TB, ACT_P]
        o_ref[...] = (out + b2_ref[...].astype(jnp.float32)).astype(o_ref.dtype)
    return kernel


def prepare_params(w1, b1, w2, b2, epilogue_dtype=None):
    """Pad/cast parameters once (hoisted out of the per-step forward)."""
    if epilogue_dtype is None:
        epilogue_dtype = _epilogue_dtype()
    if b1.ndim == 1:
        b1 = b1[None, :]
    if b2.ndim == 1:
        b2 = b2[None, :]
    obs, hid = w1.shape
    act = w2.shape[1]
    hid_p = _round_up(hid, 128)
    act_p = _round_up(act, 128)
    # Zero padding is numerically inert: padded hidden lanes get tanh(0+0)=0 and
    # the corresponding W2 rows are zero; padded act lanes are sliced off.
    w1_p = jnp.pad(w1.astype(jnp.bfloat16), ((0, 0), (0, hid_p - hid)))
    b1_p = jnp.pad(b1.astype(epilogue_dtype), ((0, 0), (0, hid_p - hid)))
    w2_p = jnp.pad(w2.astype(jnp.bfloat16), ((0, hid_p - hid), (0, act_p - act)))
    b2_p = jnp.pad(b2.astype(jnp.float32), ((0, 0), (0, act_p - act)))
    return dict(w1=w1_p, b1=b1_p, w2=w2_p, b2=b2_p,
                act_dim=act, epilogue_dtype=epilogue_dtype)


def policy_forward(states, params, *, block_b: int = 1024, out_dtype=jnp.float32):
    """states: [B, obs_dim] f32 -> actions: [B, act_dim] out_dtype."""
    B, obs = states.shape
    w1_p, b1_p, w2_p, b2_p = params["w1"], params["b1"], params["w2"], params["b2"]
    act = params["act_dim"]
    epilogue_dtype = params["epilogue_dtype"]
    assert w1_p.shape[0] == obs, "obs_dim mismatch between states and W1"
    hid_p = w1_p.shape[1]
    act_p = w2_p.shape[1]

    # Adaptive batch tiling: bounded padding waste; >= 2 tiles/TensorCore on v7x.
    n_tiles = max(pl.cdiv(B, block_b), min(_min_grid(), pl.cdiv(B, 16)))
    tb = _round_up(pl.cdiv(B, n_tiles), 16)
    b_p = tb * n_tiles
    x = states if b_p == B else jnp.pad(states, ((0, b_p - B), (0, 0)))

    flops = 2 * b_p * (obs * hid_p + hid_p * act_p)
    bytes_accessed = (b_p * obs * states.dtype.itemsize
                      + w1_p.size * 2 + w2_p.size * 2
                      + (hid_p + act_p) * 4
                      + b_p * act_p * 2)

    out_p = pl.pallas_call(
        _make_policy_kernel(epilogue_dtype),
        out_shape=jax.ShapeDtypeStruct((b_p, act_p), jnp.bfloat16),
        grid=(n_tiles,),
        in_specs=[
            pl.BlockSpec((tb, obs), lambda i: (i, 0)),        # raw f32 states, tiled on batch
            pl.BlockSpec((obs, hid_p), lambda i: (0, 0)),     # W1: VMEM-resident across grid
            pl.BlockSpec((1, hid_p), lambda i: (0, 0)),       # b1: resident
            pl.BlockSpec((hid_p, act_p), lambda i: (0, 0)),   # W2: resident
            pl.BlockSpec((1, act_p), lambda i: (0, 0)),       # b2: resident
        ],
        out_specs=pl.BlockSpec((tb, act_p), lambda i: (i, 0)),
        compiler_params=pltpu.CompilerParams(
            dimension_semantics=("parallel",)),
        cost_estimate=pl.CostEstimate(
            flops=flops,
            transcendentals=b_p * hid_p,
            bytes_accessed=bytes_accessed),
    )(x, w1_p, b1_p, w2_p, b2_p)

    # Slice + cast fuse into one small pass; kernel writeback stays bf16/lane-dense.
    return out_p[:B, :act].astype(out_dtype)


def init_params(key, obs_dim, hidden, act_dim, dtype=jnp.float32):
    """Deterministic init mimicking torch.nn.Linear default (U[-1/sqrt(fan_in), +])."""
    k1, k2, k3, k4 = jax.random.split(key, 4)
    s1 = 1.0 / jnp.sqrt(obs_dim)
    s2 = 1.0 / jnp.sqrt(hidden)
    w1 = jax.random.uniform(k1, (obs_dim, hidden), dtype, -s1, s1)
    b1 = jax.random.uniform(k2, (hidden,), dtype, -s1, s1)
    w2 = jax.random.uniform(k3, (hidden, act_dim), dtype, -s2, s2)
    b2 = jax.random.uniform(k4, (act_dim,), dtype, -s2, s2)
    return w1, b1, w2, b2


def _ref_forward(states, w1, b1, w2, b2, epilogue_dtype, out_dtype=jnp.float32):
    """Pure-JAX reference matching the kernel's dtype pipeline."""
    f32 = jnp.float32
    if b1.ndim == 1:
        b1 = b1[None, :]
    if b2.ndim == 1:
        b2 = b2[None, :]
    xb = states.astype(jnp.bfloat16).astype(f32)
    w1b = w1.astype(jnp.bfloat16).astype(f32)
    w2b = w2.astype(jnp.bfloat16).astype(f32)
    h = (xb @ w1b).astype(epilogue_dtype) + b1.astype(epilogue_dtype)
    h = jnp.tanh(h)
    hb = h.astype(jnp.bfloat16).astype(f32)
    out = hb @ w2b + b2.astype(f32)
    return out.astype(jnp.bfloat16).astype(out_dtype)


if __name__ == "__main__":
    key = jax.random.PRNGKey(0)
    k_x, k_p, k_x2 = jax.random.split(key, 3)

    obs_dim, hidden, act_dim = 32, 128, 8
    w1, b1, w2, b2 = init_params(k_p, obs_dim, hidden, act_dim)
    ep_dtype = _epilogue_dtype()
    params = prepare_params(w1, b1, w2, b2, ep_dtype)   # one-time pad/cast

    # Rollout-sized batch: exercises the batch-tiled grid.
    B = 256
    states = jax.random.normal(k_x, (B, obs_dim), jnp.float32)
    actions = jax.block_until_ready(policy_forward(states, params))
    ref = _ref_forward(states, w1, b1, w2, b2, ep_dtype)
    assert actions.shape == (B, act_dim)
    assert jnp.allclose(actions, ref, atol=2e-2, rtol=2e-2)

    # Tiny batch path (single small tile, batch padding/slicing round-trip).
    states_small = jax.random.normal(k_x2, (8, obs_dim), jnp.float32)
    actions_small = jax.block_until_ready(policy_forward(states_small, params))
    ref_small = _ref_forward(states_small, w1, b1, w2, b2, ep_dtype)
    assert actions_small.shape == (8, act_dim)
    assert jnp.allclose(actions_small, ref_small, atol=2e-2, rtol=2e-2)

    print("KERNEL_OK")
</pallas_src>

<mosaic_0001>
module attributes {stable_mosaic.version = 11 : i64} {
  func.func @kernel(%arg0: i32, %arg1: memref<256x32xf32, #tpu.memory_space<vmem>>, %arg2: memref<32x128xbf16, #tpu.memory_space<vmem>>, %arg3: memref<1x128xf32, #tpu.memory_space<vmem>>, %arg4: memref<128x128xbf16, #tpu.memory_space<vmem>>, %arg5: memref<1x128xf32, #tpu.memory_space<vmem>>, %arg6: memref<256x128xbf16, #tpu.memory_space<vmem>>) attributes {dimension_semantics = [#tpu.dimension_semantics<parallel>], iteration_bounds = array<i64: 1>, scalar_prefetch = 0 : i64, scratch_operands = 0 : i64, tpu.core_type = #tpu.core_type<tc>, window_params = [{transform_indices = @transform_0, window_bounds = array<i64: 256, 32>}, {pipeline_mode = #tpu.pipeline_mode<synchronous>, transform_indices = @transform_1, window_bounds = array<i64: 32, 128>}, {pipeline_mode = #tpu.pipeline_mode<synchronous>, transform_indices = @transform_2, window_bounds = array<i64: 1, 128>}, {pipeline_mode = #tpu.pipeline_mode<synchronous>, transform_indices = @transform_3, window_bounds = array<i64: 128, 128>}, {pipeline_mode = #tpu.pipeline_mode<synchronous>, transform_indices = @transform_4, window_bounds = array<i64: 1, 128>}, {transform_indices = @transform_5, window_bounds = array<i64: 256, 128>}]} {
    %c0 = arith.constant 0 : index
    %c0_0 = arith.constant 0 : index
    %0 = vector.load %arg1[%c0, %c0_0] : memref<256x32xf32, #tpu.memory_space<vmem>>, vector<256x32xf32>
    %1 = arith.truncf %0 : vector<256x32xf32> to vector<256x32xbf16>
    %c0_1 = arith.constant 0 : index
    %c0_2 = arith.constant 0 : index
    %2 = vector.load %arg2[%c0_1, %c0_2] : memref<32x128xbf16, #tpu.memory_space<vmem>>, vector<32x128xbf16>
    %cst = arith.constant dense<0.000000e+00> : vector<256x128xf32>
    %3 = tpu.matmul %1, %2, %cst {dimension_numbers = #tpu.dot_dimension_numbers<[1], [0], [0], [1], [0, 0, 1, 1], [], []>} : vector<256x32xbf16>, vector<32x128xbf16>, vector<256x128xf32> -> vector<256x128xf32>
    %c0_3 = arith.constant 0 : index
    %c0_4 = arith.constant 0 : index
    %4 = vector.load %arg3[%c0_3, %c0_4] : memref<1x128xf32, #tpu.memory_space<vmem>>, vector<1x128xf32>
    %5 = vector.broadcast %4 : vector<1x128xf32> to vector<256x128xf32>
    %6 = arith.addf %3, %5 : vector<256x128xf32>
    %7 = math.tanh %6 : vector<256x128xf32>
    %8 = arith.truncf %7 : vector<256x128xf32> to vector<256x128xbf16>
    %c0_5 = arith.constant 0 : index
    %c0_6 = arith.constant 0 : index
    %9 = vector.load %arg4[%c0_5, %c0_6] : memref<128x128xbf16, #tpu.memory_space<vmem>>, vector<128x128xbf16>
    %cst_7 = arith.constant dense<0.000000e+00> : vector<256x128xf32>
    %10 = tpu.matmul %8, %9, %cst_7 {dimension_numbers = #tpu.dot_dimension_numbers<[1], [0], [0], [1], [0, 0, 1, 1], [], []>} : vector<256x128xbf16>, vector<128x128xbf16>, vector<256x128xf32> -> vector<256x128xf32>
    %c0_8 = arith.constant 0 : index
    %c0_9 = arith.constant 0 : index
    %11 = vector.load %arg5[%c0_8, %c0_9] : memref<1x128xf32, #tpu.memory_space<vmem>>, vector<1x128xf32>
    %12 = vector.broadcast %11 : vector<1x128xf32> to vector<256x128xf32>
    %13 = arith.addf %10, %12 : vector<256x128xf32>
    %14 = arith.truncf %13 : vector<256x128xf32> to vector<256x128xbf16>
    %c0_10 = arith.constant 0 : index
    %c0_11 = arith.constant 0 : index
    %15 = vector.load %arg6[%c0_10, %c0_11] : memref<256x128xbf16, #tpu.memory_space<vmem>>, vector<256x128xbf16>
    tpu.vector_store %arg6[%c0_10, %c0_11], %14 {strides = array<i32>} : memref<256x128xbf16, #tpu.memory_space<vmem>>, vector<256x128xbf16>,
    return
  }
  func.func @transform_0(%arg0: i32) -> (i32, i32) {
    %c0_i32 = arith.constant 0 : i32
    %c0_i32_0 = arith.constant 0 : i32
    return %arg0, %c0_i32 : i32, i32
  }
  func.func @transform_1(%arg0: i32) -> (i32, i32) {
    %c0_i32 = arith.constant 0 : i32
    %c0_i32_0 = arith.constant 0 : i32
    %c0_i32_1 = arith.constant 0 : i32
    return %c0_i32, %c0_i32_0 : i32, i32
  }
  func.func @transform_2(%arg0: i32) -> (i32, i32) {
    %c0_i32 = arith.constant 0 : i32
    %c0_i32_0 = arith.constant 0 : i32
    %c0_i32_1 = arith.constant 0 : i32
    return %c0_i32, %c0_i32_0 : i32, i32
  }
  func.func @transform_3(%arg0: i32) -> (i32, i32) {
    %c0_i32 = arith.constant 0 : i32
    %c0_i32_0 = arith.constant 0 : i32
    %c0_i32_1 = arith.constant 0 : i32
    return %c0_i32, %c0_i32_0 : i32, i32
  }
  func.func @transform_4(%arg0: i32) -> (i32, i32) {
    %c0_i32 = arith.constant 0 : i32
    %c0_i32_0 = arith.constant 0 : i32
    %c0_i32_1 = arith.constant 0 : i32
    return %c0_i32, %c0_i32_0 : i32, i32
  }
  func.func @transform_5(%arg0: i32) -> (i32, i32) {
    %c0_i32 = arith.constant 0 : i32
    %c0_i32_0 = arith.constant 0 : i32
    return %arg0, %c0_i32 : i32, i32
  }
}

</mosaic_0001>

<bundles_post_ra>
// kernel: tpu_custom_call.1
= control target key start
LH: loop header
LB: loop body
LE: loop exit
PB: predicated region body
PF: predicated region fallthrough
CT: control target
= control target key end

     0   :  { %vm93_vm0 = vcmask 261120   ;;  %s1450_s0 = inlined_call_operand.vmem [shape: f32[256,32], index: 0, kind: input, shape index: {}]   ;;  %s1451_s1 = inlined_call_operand.vmem [shape: bf16[32,128], index: 1, kind: input, shape index: {}]   ;;  %s1452_s2 = inlined_call_operand.vmem [shape: f32[1,128], index: 2, kind: input, shape index: {}]   ;;  %s1453_s3 = inlined_call_operand.vmem [shape: bf16[128,128], index: 3, kind: input, shape index: {}]   ;;  %s1454_s4 = inlined_call_operand.vmem [shape: f32[1,128], index: 4, kind: input, shape index: {}]   ;;  %s1455_s5 = inlined_call_operand.hbm [shape: bf16[256,128], index: 5, kind: output, shape index: {}]  }
   0x1   :  { %v1091_v0 = vld [vmem:[%s1451_s1] sm:$0xff]   ;;  %v1092_v1 = vld [vmem:[%s1451_s1 + $0x8] sm:$0xff]   ;;  %v24_v5 = vld [vmem:[%s1450_s0 + $0x10] sm:$0xff] }
   0x2   :  { %988 = vmatprep.subr.bf16.mxu0 %v1091_v0  ;;  %v22_v2 = vld [vmem:[%s1450_s0] sm:$0xff]  ;;  %v23_v3 = vld [vmem:[%s1450_s0 + $0x8] sm:$0xff]  ;;  %v25_v6 = vld [vmem:[%s1450_s0 + $0x18] sm:$0xff] }
   0x3   :  { %989 = vmatpush3.bf16.msra.mxu0 %v1091_v0  ;;  %v54_v4 = vpack.c.bf16 %v23_v3, %v22_v2  ;;  %v26_v7 = vld [vmem:[%s1450_s0 + $0x20] sm:$0xff]  ;;  %v27_v8 = vld [vmem:[%s1450_s0 + $0x28] sm:$0xff]  ;;  %v55_v9 = vpack.c.bf16 %v25_v6, %v24_v5  ;;  %v28_v11 = vld [vmem:[%s1450_s0 + $0x30] sm:$0xff] }
   0x4   :  { %990 = vmatprep.subr.bf16.mxu0 %v1092_v1  ;;  %v56_v10 = vpack.c.bf16 %v27_v8, %v26_v7  ;;  %v29_v12 = vld [vmem:[%s1450_s0 + $0x38] sm:$0xff]  ;;  %v30_v13 = vld [vmem:[%s1450_s0 + $0x40] sm:$0xff]  ;;  %v31_v14 = vld [vmem:[%s1450_s0 + $0x48] sm:$0xff] }
   0x5   :  { %992 = vmatprep.mubr.msk.bf16.mxu0 %vm93_vm0, %v54_v4  ;;  %v1093_v15 = vld [vmem:[%s1453_s3] sm:$0xff]   ;;  %v57_v16 = vpack.c.bf16 %v29_v12, %v28_v11  ;;  %v1094_v17 = vld [vmem:[%s1453_s3 + $0x8] sm:$0xff]   ;;  %v58_v18 = vpack.c.bf16 %v31_v14, %v30_v13  ;;  %v1095_v19 = vld [vmem:[%s1453_s3 + $0x10] sm:$0xff]  }
   0x6   :  { %1072 = vmatprep.subr.bf16.mxu1 %v1093_v15  ;;  %v32_v20 = vld [vmem:[%s1450_s0 + $0x50] sm:$0xff]  ;;  %v33_v21 = vld [vmem:[%s1450_s0 + $0x58] sm:$0xff] }
   0x7   :  { %991 = vmatpush3.bf16.msra.mxu0 %v1092_v1  ;;  %1080 = vmatpush3.bf16.msra.mxu1 %v1093_v15 }
   0x8   :  { %1024 = vmatprep.subr.bf16.mxu0 %v1093_v15  ;;  %1073 = vmatprep.subr.bf16.mxu1 %v1094_v17 }
   0xa   :  { %993 = vmatmul.mubr.msk.bf16.vlgmr.msra.gmra.mrb[0].mxu0 %vm93_vm0, %v55_v9 }
   0xb   :  { %996 = vmatprep.mubr.msk.bf16.mxu0 %vm93_vm0, %v56_v10  ;;  %1025 = vmatpush3.bf16.msra.mxu0 %v1093_v15 }
   0xc   :  { %1026 = vmatprep.subr.bf16.mxu0 %v1094_v17 }
  0x12   :  { %997 = vmatmul.mubr.msk.bf16.gmra.mrb[4].mxu0 %vm93_vm0, %v57_v16 }
  0x13   :  { %1000 = vmatprep.mubr.msk.bf16.mxu0 %vm93_vm0, %v58_v18 }
  0x14   :  { %10 = vsyncpa [#allocation3], 0  ;;  %v34_v22 = vld [vmem:[%s1450_s0 + $0x60] sm:$0xff]  ;;  %v35_v23 = vld [vmem:[%s1450_s0 + $0x68] sm:$0xff]  ;;  %1027 = vmatpush3.bf16.msra.mxu0 %v1094_v17  ;;  %1081 = vmatpush3.bf16.msra.mxu1 %v1094_v17  ;;  %v59_v24 = vpack.c.bf16 %v33_v21, %v32_v20 }
  0x15   :  { %1028 = vmatprep.subr.bf16.mxu0 %v1095_v19  ;;  %1074 = vmatprep.subr.bf16.mxu1 %v1095_v19  ;;  %v60_v25 = vpack.c.bf16 %v35_v23, %v34_v22  ;;  %v36_v26 = vld [vmem:[%s1450_s0 + $0x70] sm:$0xff]  ;;  %v37_v27 = vld [vmem:[%s1450_s0 + $0x78] sm:$0xff]  ;;  %v38_v28 = vld [vmem:[%s1450_s0 + $0x80] sm:$0xff] }
  0x16   :  { %v39_v29 = vld [vmem:[%s1450_s0 + $0x88] sm:$0xff]  ;;  %v61_v30 = vpack.c.bf16 %v37_v27, %v36_v26  ;;  %v40_v32 = vld [vmem:[%s1450_s0 + $0x90] sm:$0xff]  ;;  %v41_v33 = vld [vmem:[%s1450_s0 + $0x98] sm:$0xff] }
  0x17   :  { %v62_v31 = vpack.c.bf16 %v39_v29, %v38_v28  ;;  %v42_v34 = vld [vmem:[%s1450_s0 + $0xa0] sm:$0xff]  ;;  %v43_v35 = vld [vmem:[%s1450_s0 + $0xa8] sm:$0xff]  ;;  %v63_v36 = vpack.c.bf16 %v41_v33, %v40_v32  ;;  %v44_v38 = vld [vmem:[%s1450_s0 + $0xb0] sm:$0xff] }
  0x18   :  { %1029 = vmatpush3.bf16.msra.mxu0 %v1095_v19  ;;  %1082 = vmatpush3.bf16.msra.mxu1 %v1095_v19  ;;  %v64_v37 = vpack.c.bf16 %v43_v35, %v42_v34  ;;  %v45_v39 = vld [vmem:[%s1450_s0 + $0xb8] sm:$0xff]  ;;  %v46_v40 = vld [vmem:[%s1450_s0 + $0xc0] sm:$0xff]  ;;  %v47_v41 = vld [vmem:[%s1450_s0 + $0xc8] sm:$0xff] }
  0x19   :  { %v65_v42 = vpack.c.bf16 %v45_v39, %v44_v38  ;;  %v66_v43 = vpack.c.bf16 %v47_v41, %v46_v40  ;;  %v48_v44 = vld [vmem:[%s1450_s0 + $0xd0] sm:$0xff]  ;;  %v49_v45 = vld [vmem:[%s1450_s0 + $0xd8] sm:$0xff]  ;;  %v50_v46 = vld [vmem:[%s1450_s0 + $0xe0] sm:$0xff] }
  0x1a   :  { %1001 = vmatmul.mubr.msk.bf16.gmra.mrb[8].mxu0 %vm93_vm0, %v59_v24  ;;  %v51_v47 = vld [vmem:[%s1450_s0 + $0xe8] sm:$0xff]  ;;  %v67_v48 = vpack.c.bf16 %v49_v45, %v48_v44  ;;  %v52_v50 = vld [vmem:[%s1450_s0 + $0xf0] sm:$0xff]  ;;  %v53_v51 = vld [vmem:[%s1450_s0 + $0xf8] sm:$0xff] }
  0x1b   :  { %1004 = vmatprep.mubr.msk.bf16.mxu0 %vm93_vm0, %v60_v25  ;;  %v68_v49 = vpack.c.bf16 %v51_v47, %v50_v46  ;;  %v69_v52 = vpack.c.bf16 %v53_v51, %v52_v50  ;;  %v1096_v53 = vld [vmem:[%s1453_s3 + $0x18] sm:$0xff]   ;;  %v1097_v54 = vld [vmem:[%s1453_s3 + $0x20] sm:$0xff]   ;;  %v1098_v55 = vld [vmem:[%s1453_s3 + $0x28] sm:$0xff]  }
  0x1c   :  { %1030 = vmatprep.subr.bf16.mxu0 %v1096_v53  ;;  %1075 = vmatprep.subr.bf16.mxu1 %v1096_v53  ;;  %v1099_v56 = vld [vmem:[%s1453_s3 + $0x30] sm:$0xff]   ;;  %v1100_v57 = vld [vmem:[%s1453_s3 + $0x38] sm:$0xff]   ;;  %v1367_v58 = vld [vmem:[%s1452_s2] ss:$0 sm:$0xff] }
  0x1d   :  { %1031 = vmatpush3.bf16.msra.mxu0 %v1096_v53  ;;  %1083 = vmatpush3.bf16.msra.mxu1 %v1096_v53 }
  0x1e   :  { %1032 = vmatprep.subr.bf16.mxu0 %v1097_v54  ;;  %1076 = vmatprep.subr.bf16.mxu1 %v1097_v54 }
  0x21   :  { %1033 = vmatpush3.bf16.msra.mxu0 %v1097_v54  ;;  %1084 = vmatpush3.bf16.msra.mxu1 %v1097_v54 }
  0x22   :  { %1005 = vmatmul.mubr.msk.bf16.gmra.mrb[12].mxu0 %vm93_vm0, %v61_v30  ;;  %1034 = vmatprep.subr.bf16.mxu0 %v1098_v55 }
  0x23   :  { %1008 = vmatprep.mubr.msk.bf16.mxu0 %vm93_vm0, %v62_v31  ;;  %1077 = vmatprep.subr.bf16.mxu1 %v1098_v55 }
  0x25   :  { %1035 = vmatpush3.bf16.msra.mxu0 %v1098_v55  ;;  %1085 = vmatpush3.bf16.msra.mxu1 %v1098_v55 }
  0x26   :  { %1036 = vmatprep.subr.bf16.mxu0 %v1099_v56  ;;  %1078 = vmatprep.subr.bf16.mxu1 %v1099_v56 }
  0x29   :  { %1037 = vmatpush3.bf16.msra.mxu0 %v1099_v56  ;;  %1086 = vmatpush3.bf16.msra.mxu1 %v1099_v56 }
  0x2a   :  { %1009 = vmatmul.mubr.msk.bf16.gmra.mrb[16].mxu0 %vm93_vm0, %v63_v36  ;;  %1038 = vmatprep.subr.bf16.mxu0 %v1100_v57 }
  0x2b   :  { %1012 = vmatprep.mubr.msk.bf16.mxu0 %vm93_vm0, %v64_v37  ;;  %1079 = vmatprep.subr.bf16.mxu1 %v1100_v57 }
  0x2d   :  { %1039 = vmatpush3.bf16.msra.mxu0 %v1100_v57  ;;  %1087 = vmatpush3.bf16.msra.mxu1 %v1100_v57 }
  0x32   :  { %1013 = vmatmul.mubr.msk.bf16.gmra.mrb[20].mxu0 %vm93_vm0, %v65_v42 }
  0x33   :  { %1016 = vmatprep.mubr.msk.bf16.mxu0 %vm93_vm0, %v66_v43 }
  0x3a   :  { %1017 = vmatmul.mubr.msk.bf16.gmra.mrb[24].mxu0 %vm93_vm0, %v67_v48 }
  0x3b   :  { %1020 = vmatprep.mubr.msk.bf16.mxu0 %vm93_vm0, %v68_v49 }
  0x42   :  { %1021 = vmatmul.mubr.msk.bf16.gmra.mrb[28].mxu0 %vm93_vm0, %v69_v52 }
  0xdd   :  { %v994_v59 = vpop.f32.mrb[0].mxu0 }
  0xde   :  { %v185_v60 = vadd.f32 %v994_v59, %v1367_v58  ;;  %v176_v61 = vpop.f32.mrb[1].mxu0 }
  0xdf   :  { %v177_v62 = vadd.f32 %v1367_v58, %v176_v61  ;;  %v995_v63 = vpop.f32.mrb[2].mxu0 }
  0xe0   :  { %1101 = vtanh.f32 %v185_v60  ;;  %v188_v0 = vadd.f32 %v995_v63, %v1367_v58  ;;  %v179_v1 = vpop.f32.mrb[3].mxu0 }
  0xe1   :  { %1103 = vtanh.f32 %v177_v62  ;;  %v180_v2 = vadd.f32 %v1367_v58, %v179_v1 }
  0xe2   :  { %1105 = vtanh.f32 %v188_v0 }
  0xe3   :  { %1107 = vtanh.f32 %v180_v2 }
  0xe5   :  { %v998_v3 = vpop.f32.mrb[4].mxu0 }
  0xe6   :  { %v201_v4 = vadd.f32 %v998_v3, %v1367_v58  ;;  %v192_v5 = vpop.f32.mrb[5].mxu0 }
  0xe7   :  { %v193_v6 = vadd.f32 %v1367_v58, %v192_v5  ;;  %v999_v7 = vpop.f32.mrb[6].mxu0 }
  0xe8   :  { %1109 = vtanh.f32 %v201_v4  ;;  %v204_v8 = vadd.f32 %v999_v7, %v1367_v58  ;;  %v195_v9 = vpop.f32.mrb[7].mxu0 }
  0xe9   :  { %1111 = vtanh.f32 %v193_v6  ;;  %v196_v10 = vadd.f32 %v1367_v58, %v195_v9 }
  0xea   :  { %v1102_v11 = vpop.eup %1101  ;;  %1113 = vtanh.f32 %v204_v8 }
  0xeb   :  { %v1104_v12 = vpop.eup %1103  ;;  %1115 = vtanh.f32 %v196_v10 }
  0xec   :  { %v1106_v13 = vpop.eup %1105 }
  0xed   :  { %v1108_v14 = vpop.eup %1107  ;;  %v1002_v15 = vpop.f32.mrb[8].mxu0  ;;  %v336_v16 = vpack.c.bf16 %v1106_v13, %v1102_v11 }
  0xee   :  { %v217_v17 = vadd.f32 %v1002_v15, %v1367_v58  ;;  %v208_v18 = vpop.f32.mrb[9].mxu0  ;;  %v335_v19 = vpack.c.bf16 %v1108_v14, %v1104_v12 }
  0xef   :  { %v209_v20 = vadd.f32 %v1367_v58, %v208_v18  ;;  %v1003_v21 = vpop.f32.mrb[10].mxu0 }
  0xf0   :  { %1117 = vtanh.f32 %v217_v17  ;;  %v220_v22 = vadd.f32 %v1003_v21, %v1367_v58  ;;  %v211_v23 = vpop.f32.mrb[11].mxu0  ;;  %1040 = vmatprep.mubr.bf16.mxu0 %v335_v19 }
  0xf1   :  { %1119 = vtanh.f32 %v209_v20  ;;  %v212_v24 = vadd.f32 %v1367_v58, %v211_v23  ;;  %1041 = vmatmul.mubr.bf16.vlgmr.msra.gmra.mrb[32].mxu0 %v336_v16 }
  0xf2   :  { %v1110_v25 = vpop.eup %1109  ;;  %1121 = vtanh.f32 %v220_v22 }
  0xf3   :  { %v1112_v26 = vpop.eup %1111  ;;  %1123 = vtanh.f32 %v212_v24 }
  0xf4   :  { %v1114_v27 = vpop.eup %1113 }
  0xf5   :  { %v1116_v28 = vpop.eup %1115  ;;  %v1006_v29 = vpop.f32.mrb[12].mxu0  ;;  %v338_v30 = vpack.c.bf16 %v1114_v27, %v1110_v25 }
  0xf6   :  { %v233_v31 = vadd.f32 %v1006_v29, %v1367_v58  ;;  %v224_v32 = vpop.f32.mrb[13].mxu0  ;;  %v337_v33 = vpack.c.bf16 %v1116_v28, %v1112_v26 }
  0xf7   :  { %v225_v34 = vadd.f32 %v1367_v58, %v224_v32  ;;  %v1007_v35 = vpop.f32.mrb[14].mxu0 }
  0xf8   :  { %1125 = vtanh.f32 %v233_v31  ;;  %v236_v36 = vadd.f32 %v1007_v35, %v1367_v58  ;;  %v227_v37 = vpop.f32.mrb[15].mxu0  ;;  %1044 = vmatprep.mubr.bf16.mxu1 %v337_v33 }
  0xf9   :  { %1127 = vtanh.f32 %v225_v34  ;;  %v228_v38 = vadd.f32 %v1367_v58, %v227_v37  ;;  %1045 = vmatmul.mubr.bf16.vlgmr.msra.gmra.mrb[0].mxu1 %v338_v30 }
  0xfa   :  { %v1118_v39 = vpop.eup %1117  ;;  %1129 = vtanh.f32 %v236_v36 }
  0xfb   :  { %v1120_v40 = vpop.eup %1119  ;;  %1131 = vtanh.f32 %v228_v38 }
  0xfc   :  { %v1122_v41 = vpop.eup %1121 }
  0xfd   :  { %v1124_v42 = vpop.eup %1123  ;;  %v1010_v43 = vpop.f32.mrb[16].mxu0  ;;  %v340_v44 = vpack.c.bf16 %v1122_v41, %v1118_v39 }
  0xfe   :  { %v249_v45 = vadd.f32 %v1010_v43, %v1367_v58  ;;  %v240_v46 = vpop.f32.mrb[17].mxu0  ;;  %v339_v47 = vpack.c.bf16 %v1124_v42, %v1120_v40 }
  0xff   :  { %v241_v48 = vadd.f32 %v1367_v58, %v240_v46  ;;  %v1011_v49 = vpop.f32.mrb[18].mxu0 }
 0x100   :  { %1133 = vtanh.f32 %v249_v45  ;;  %v252_v50 = vadd.f32 %v1011_v49, %v1367_v58  ;;  %v243_v51 = vpop.f32.mrb[19].mxu0  ;;  %1048 = vmatprep.mubr.bf16.mxu1 %v339_v47 }
 0x101   :  { %1135 = vtanh.f32 %v241_v48  ;;  %v244_v52 = vadd.f32 %v1367_v58, %v243_v51  ;;  %1049 = vmatmul.mubr.bf16.gmra.mrb[4].mxu1 %v340_v44  ;;  %v1404_v44 = vld [vmem:[%s1454_s4] ss:$0 sm:$0xff]  ;;  %s1189_s4 = smov [#allocation2]  }
 0x102   :  { %v1126_v53 = vpop.eup %1125  ;;  %1137 = vtanh.f32 %v252_v50  ;;  %s748_s25 = sshll.u32 %s1189_s4, 4  ;;  %s749_s25 = int_to_ptr.vmem [resolvable:$true] %s748_s25 }
 0x103   :  { %v1128_v54 = vpop.eup %1127  ;;  %1139 = vtanh.f32 %v244_v52  ;;  %s1165_s26 = scalar_lea.vmem %s749_s25, 2048  ;;  %p1170_p1 = scmp.lt.s32.totalorder %s749_s25, %s749_s25 }
 0x104   :  { %v1130_v55 = vpop.eup %1129  ;;  %p1166_p0 = scmp.ne.s32.totalorder %s749_s25, %s1165_s26  ;;  %p1171_p2 = scmp.lt.s32.totalorder %s1165_s26, %s1165_s26 }
 0x105   :  { %v1132_v56 = vpop.eup %1131  ;;  %v1014_v57 = vpop.f32.mrb[20].mxu0  ;;  %v342_v59 = vpack.c.bf16 %v1130_v55, %v1126_v53 }
 0x106   :  { %v265_v60 = vadd.f32 %v1014_v57, %v1367_v58  ;;  %v256_v61 = vpop.f32.mrb[21].mxu0  ;;  %v341_v62 = vpack.c.bf16 %v1132_v56, %v1128_v54  ;;  %p1172_p3 = por %p1171_p2, %p1170_p1 }
 0x107   :  { %v257_v63 = vadd.f32 %v1367_v58, %v256_v61  ;;  %v1015_v0 = vpop.f32.mrb[22].mxu0 }
 0x108   :  { %1141 = vtanh.f32 %v265_v60  ;;  %v268_v1 = vadd.f32 %v1015_v0, %v1367_v58  ;;  %v259_v2 = vpop.f32.mrb[23].mxu0  ;;  %1052 = vmatprep.mubr.bf16.mxu1 %v341_v62  ;;  %p1173_p4 = pnand %p1172_p3, %p1166_p0 }
 0x109   :  { %1143 = vtanh.f32 %v257_v63  ;;  %v260_v3 = vadd.f32 %v1367_v58, %v259_v2  ;;  %1053 = vmatmul.mubr.bf16.gmra.mrb[8].mxu1 %v342_v59 }
 0x10a   :  { %v1134_v4 = vpop.eup %1133  ;;  %1145 = vtanh.f32 %v268_v1 }
 0x10b   :  { %v1136_v5 = vpop.eup %1135  ;;  %1147 = vtanh.f32 %v260_v3 }
 0x10c   :  { %v1138_v6 = vpop.eup %1137 }
 0x10d   :  { %v1140_v7 = vpop.eup %1139  ;;  %v1018_v8 = vpop.f32.mrb[24].mxu0  ;;  %v344_v9 = vpack.c.bf16 %v1138_v6, %v1134_v4 }
 0x10e   :  { %v281_v10 = vadd.f32 %v1018_v8, %v1367_v58  ;;  %v272_v11 = vpop.f32.mrb[25].mxu0  ;;  %v343_v12 = vpack.c.bf16 %v1140_v7, %v1136_v5 }
 0x10f   :  { %v273_v13 = vadd.f32 %v1367_v58, %v272_v11  ;;  %v1019_v14 = vpop.f32.mrb[26].mxu0 }
 0x110   :  { %1149 = vtanh.f32 %v281_v10  ;;  %v284_v15 = vadd.f32 %v1019_v14, %v1367_v58  ;;  %v275_v16 = vpop.f32.mrb[27].mxu0  ;;  %1056 = vmatprep.mubr.bf16.mxu1 %v343_v12 }
 0x111   :  { %1151 = vtanh.f32 %v273_v13  ;;  %v276_v17 = vadd.f32 %v1367_v58, %v275_v16  ;;  %1057 = vmatmul.mubr.bf16.gmra.mrb[12].mxu1 %v344_v9 }
 0x112   :  { %v1142_v18 = vpop.eup %1141  ;;  %1153 = vtanh.f32 %v284_v15 }
 0x113   :  { %v1144_v19 = vpop.eup %1143  ;;  %1155 = vtanh.f32 %v276_v17 }
 0x114   :  { %v1146_v20 = vpop.eup %1145 }
 0x115   :  { %v1148_v21 = vpop.eup %1147  ;;  %v1022_v22 = vpop.f32.mrb[28].mxu0  ;;  %v346_v23 = vpack.c.bf16 %v1146_v20, %v1142_v18 }
 0x116   :  { %v297_v24 = vadd.f32 %v1022_v22, %v1367_v58  ;;  %v288_v25 = vpop.f32.mrb[29].mxu0  ;;  %v345_v26 = vpack.c.bf16 %v1148_v21, %v1144_v19 }
 0x117   :  { %v289_v27 = vadd.f32 %v1367_v58, %v288_v25  ;;  %v1023_v28 = vpop.f32.mrb[30].mxu0 }
 0x118   :  { %1157 = vtanh.f32 %v297_v24  ;;  %v300_v29 = vadd.f32 %v1023_v28, %v1367_v58  ;;  %v291_v30 = vpop.f32.mrb[31].mxu0  ;;  %1060 = vmatprep.mubr.bf16.mxu1 %v345_v26 }
 0x119   :  { %1159 = vtanh.f32 %v289_v27  ;;  %v292_v31 = vadd.f32 %v1367_v58, %v291_v30  ;;  %1061 = vmatmul.mubr.bf16.gmra.mrb[16].mxu1 %v346_v23 }
 0x11a   :  { %v1150_v32 = vpop.eup %1149  ;;  %1161 = vtanh.f32 %v300_v29 }
 0x11b   :  { %v1152_v33 = vpop.eup %1151  ;;  %1163 = vtanh.f32 %v292_v31 }
 0x11c   :  { %v1154_v34 = vpop.eup %1153 }
 0x11d   :  { %v1156_v35 = vpop.eup %1155  ;;  %v348_v36 = vpack.c.bf16 %v1154_v34, %v1150_v32 }
 0x11e   :  { %v347_v37 = vpack.c.bf16 %v1156_v35, %v1152_v33 }
 0x120   :  { %1064 = vmatprep.mubr.bf16.mxu1 %v347_v37 }
 0x121   :  { %1065 = vmatmul.mubr.bf16.gmra.mrb[20].mxu1 %v348_v36 }
 0x122   :  { %v1158_v38 = vpop.eup %1157 }
 0x123   :  { %v1160_v39 = vpop.eup %1159 }
 0x124   :  { %v1162_v40 = vpop.eup %1161 }
 0x125   :  { %v1164_v41 = vpop.eup %1163  ;;  %v350_v42 = vpack.c.bf16 %v1162_v40, %v1158_v38 }
 0x126   :  { %v349_v43 = vpack.c.bf16 %v1164_v41, %v1160_v39 }
 0x128   :  { %1068 = vmatprep.mubr.bf16.mxu1 %v349_v43 }
 0x129   :  { %1069 = vmatmul.mubr.bf16.gmra.mrb[24].mxu1 %v350_v42 }
 0x1c4   :  { %v1042_v58 = vpop.f32.mrb[32].mxu0 }
 0x1c5   :  { %v456_v45 = vpop.f32.mrb[33].mxu0  ;;  %v465_v47 = vadd.f32 %v1042_v58, %v1404_v44 }
 0x1c6   :  { %v1043_v46 = vpop.f32.mrb[34].mxu0  ;;  %v457_v50 = vadd.f32 %v1404_v44, %v456_v45 }
 0x1c7   :  { %v468_v48 = vadd.f32 %v1043_v46, %v1404_v44  ;;  %v459_v49 = vpop.f32.mrb[35].mxu0 }
 0x1c8   :  { %v460_v51 = vadd.f32 %v1404_v44, %v459_v49 }
 0x1c9   :  { %v859_v52 = vpack.c.bf16 %v468_v48, %v465_v47 }
 0x1ca   :  { %v854_v53 = vpack.c.bf16 %v460_v51, %v457_v50 }
 0x1cb   :  { %931 = vst [vmem:[#allocation2 + $0x8] sm:$0xff] %v859_v52  }
 0x1cc   :  { %855 = vst [vmem:[#allocation2] sm:$0xff] %v854_v53   ;;  %v1046_v54 = vpop.f32.mrb[0].mxu1 }
 0x1cd   :  { %v472_v55 = vpop.f32.mrb[1].mxu1  ;;  %v481_v57 = vadd.f32 %v1046_v54, %v1404_v44 }
 0x1ce   :  { %v1047_v56 = vpop.f32.mrb[2].mxu1  ;;  %v473_v61 = vadd.f32 %v1404_v44, %v472_v55 }
 0x1cf   :  { %v484_v59 = vadd.f32 %v1047_v56, %v1404_v44  ;;  %v475_v60 = vpop.f32.mrb[3].mxu1 }
 0x1d0   :  { %v476_v62 = vadd.f32 %v1404_v44, %v475_v60 }
 0x1d1   :  { %v869_v63 = vpack.c.bf16 %v484_v59, %v481_v57 }
 0x1d2   :  { %v864_v0 = vpack.c.bf16 %v476_v62, %v473_v61 }
 0x1d3   :  { %933 = vst [vmem:[#allocation2 + $0x18] sm:$0xff] %v869_v63  }
 0x1d4   :  { %932 = vst [vmem:[#allocation2 + $0x10] sm:$0xff] %v864_v0   ;;  %v1050_v1 = vpop.f32.mrb[4].mxu1 }
 0x1d5   :  { %v488_v2 = vpop.f32.mrb[5].mxu1  ;;  %v497_v4 = vadd.f32 %v1050_v1, %v1404_v44 }
 0x1d6   :  { %v1051_v3 = vpop.f32.mrb[6].mxu1  ;;  %v489_v7 = vadd.f32 %v1404_v44, %v488_v2 }
 0x1d7   :  { %v500_v5 = vadd.f32 %v1051_v3, %v1404_v44  ;;  %v491_v6 = vpop.f32.mrb[7].mxu1 }
 0x1d8   :  { %v492_v8 = vadd.f32 %v1404_v44, %v491_v6 }
 0x1d9   :  { %v879_v9 = vpack.c.bf16 %v500_v5, %v497_v4 }
 0x1da   :  { %v874_v10 = vpack.c.bf16 %v492_v8, %v489_v7 }
 0x1db   :  { %935 = vst [vmem:[#allocation2 + $0x28] sm:$0xff] %v879_v9  }
 0x1dc   :  { %934 = vst [vmem:[#allocation2 + $0x20] sm:$0xff] %v874_v10   ;;  %v1054_v11 = vpop.f32.mrb[8].mxu1 }
 0x1dd   :  { %v504_v12 = vpop.f32.mrb[9].mxu1  ;;  %v513_v14 = vadd.f32 %v1054_v11, %v1404_v44 }
 0x1de   :  { %v1055_v13 = vpop.f32.mrb[10].mxu1  ;;  %v505_v17 = vadd.f32 %v1404_v44, %v504_v12 }
 0x1df   :  { %v516_v15 = vadd.f32 %v1055_v13, %v1404_v44  ;;  %v507_v16 = vpop.f32.mrb[11].mxu1 }
 0x1e0   :  { %v508_v18 = vadd.f32 %v1404_v44, %v507_v16 }
 0x1e1   :  { %v889_v19 = vpack.c.bf16 %v516_v15, %v513_v14 }
 0x1e2   :  { %v884_v20 = vpack.c.bf16 %v508_v18, %v505_v17 }
 0x1e3   :  { %937 = vst [vmem:[#allocation2 + $0x38] sm:$0xff] %v889_v19  }
 0x1e4   :  { %936 = vst [vmem:[#allocation2 + $0x30] sm:$0xff] %v884_v20   ;;  %v1058_v21 = vpop.f32.mrb[12].mxu1 }
 0x1e5   :  { %v520_v22 = vpop.f32.mrb[13].mxu1  ;;  %v529_v24 = vadd.f32 %v1058_v21, %v1404_v44 }
 0x1e6   :  { %v1059_v23 = vpop.f32.mrb[14].mxu1  ;;  %v521_v27 = vadd.f32 %v1404_v44, %v520_v22 }
 0x1e7   :  { %v532_v25 = vadd.f32 %v1059_v23, %v1404_v44  ;;  %v523_v26 = vpop.f32.mrb[15].mxu1 }
 0x1e8   :  { %v524_v28 = vadd.f32 %v1404_v44, %v523_v26 }
 0x1e9   :  { %v899_v29 = vpack.c.bf16 %v532_v25, %v529_v24 }
 0x1ea   :  { %v894_v30 = vpack.c.bf16 %v524_v28, %v521_v27 }
 0x1eb   :  { %939 = vst [vmem:[#allocation2 + $0x48] sm:$0xff] %v899_v29  }
 0x1ec   :  { %938 = vst [vmem:[#allocation2 + $0x40] sm:$0xff] %v894_v30   ;;  %v1062_v31 = vpop.f32.mrb[16].mxu1 }
 0x1ed   :  { %v536_v32 = vpop.f32.mrb[17].mxu1  ;;  %v545_v34 = vadd.f32 %v1062_v31, %v1404_v44 }
 0x1ee   :  { %v1063_v33 = vpop.f32.mrb[18].mxu1  ;;  %v537_v37 = vadd.f32 %v1404_v44, %v536_v32 }
 0x1ef   :  { %v548_v35 = vadd.f32 %v1063_v33, %v1404_v44  ;;  %v539_v36 = vpop.f32.mrb[19].mxu1 }
 0x1f0   :  { %v540_v38 = vadd.f32 %v1404_v44, %v539_v36 }
 0x1f1   :  { %v909_v39 = vpack.c.bf16 %v548_v35, %v545_v34 }
 0x1f2   :  { %v904_v40 = vpack.c.bf16 %v540_v38, %v537_v37 }
 0x1f3   :  { %941 = vst [vmem:[#allocation2 + $0x58] sm:$0xff] %v909_v39  }
 0x1f4   :  { %940 = vst [vmem:[#allocation2 + $0x50] sm:$0xff] %v904_v40   ;;  %v1066_v41 = vpop.f32.mrb[20].mxu1 }
 0x1f5   :  { %v552_v42 = vpop.f32.mrb[21].mxu1  ;;  %v561_v58 = vadd.f32 %v1066_v41, %v1404_v44 }
 0x1f6   :  { %v1067_v43 = vpop.f32.mrb[22].mxu1  ;;  %v553_v47 = vadd.f32 %v1404_v44, %v552_v42 }
 0x1f7   :  { %v564_v45 = vadd.f32 %v1067_v43, %v1404_v44  ;;  %v555_v46 = vpop.f32.mrb[23].mxu1 }
 0x1f8   :  { %v556_v48 = vadd.f32 %v1404_v44, %v555_v46 }
 0x1f9   :  { %v919_v49 = vpack.c.bf16 %v564_v45, %v561_v58 }
 0x1fa   :  { %v914_v50 = vpack.c.bf16 %v556_v48, %v553_v47 }
 0x1fb   :  { %943 = vst [vmem:[#allocation2 + $0x68] sm:$0xff] %v919_v49  }
 0x1fc   :  { %942 = vst [vmem:[#allocation2 + $0x60] sm:$0xff] %v914_v50   ;;  %v1070_v51 = vpop.f32.mrb[24].mxu1 }
 0x1fd   :  { %v568_v52 = vpop.f32.mrb[25].mxu1  ;;  %v577_v54 = vadd.f32 %v1070_v51, %v1404_v44 }
 0x1fe   :  { %v1071_v53 = vpop.f32.mrb[26].mxu1  ;;  %v569_v57 = vadd.f32 %v1404_v44, %v568_v52 }
 0x1ff   :  { %v580_v55 = vadd.f32 %v1071_v53, %v1404_v44  ;;  %v571_v56 = vpop.f32.mrb[27].mxu1 }
 0x200   :  { %v572_v59 = vadd.f32 %v1404_v44, %v571_v56 }
 0x201   :  { %v929_v60 = vpack.c.bf16 %v580_v55, %v577_v54 }
 0x202   :  { %v924_v61 = vpack.c.bf16 %v572_v59, %v569_v57 }
 0x203   :  { %945 = vst [vmem:[#allocation2 + $0x78] sm:$0xff] %v929_v60  }
 0x204   :  { %944 = vst [vmem:[#allocation2 + $0x70] sm:$0xff] %v924_v61  }
 0x205   :  { %1176 = shalt.err (!%p1173_p4)
}
 0x206   :  { %s1177_s29 = scalar_lea.hbm %s1455_s5, 2048 }
 0x207   :  { %p1178_p5 = scmp.ne.s32.totalorder %s1455_s5, %s1177_s29  ;;  %p1181_p6 = scmp.lt.u32.totalorder %s1177_s29, %s1455_s5 }
 0x209   :  { %p1183_p7 = pnand %p1181_p6, %p1178_p5 }
 0x20b   :  { %1186 = shalt.err (!%p1183_p7)
}
 0x20c   :  { %s1190_s8 = smov 64   ;;  %s1191_s9 = smov 4  }
 0x20d   :  { %754 = dma.vmem_to_hbm [thread:$0]  %s749_s25, 2048, %s1455_s5, [#allocation3], %s1190_s8, %s1190_s8, %s1191_s9  }
 0x20e   :  { %1187 = dma.done.wait [#allocation3], 2048  }
 0x20f   :  { %1188 = vsyncadd [#allocation3], 4294965248 }
 0x210   :  { %758 = vsyncpa [#allocation3], 1 }

</bundles_post_ra>
